<compile_context>
chip_gen: v7x
topology: tpu7x:2x2x1
jax: 0.10.0
libtpu: 0.0.40
codegen_flags: <defaults>
</compile_context>

<pallas_src>
import functools

import jax
import jax.numpy as jnp
import numpy as np
from jax.experimental import pallas as pl
from jax.experimental.pallas import tpu as pltpu

CONFIG = dict(
    vocab_size=64,
    d_model=32,
    # must cover 512 + padding_idx, because create_position_ids hardcodes 511/512 offsets
    max_position_embedding=520,
    padding_idx=1,
    padding_index=1,     # used for token_embedding padding row (same value in practice)
    cls_idx=62,
    sep_idx=63,
    add_pe=True,
    dropout=0.1,         # identity at inference
    layer_norm_eps=1e-12,
)


def _round_up(x, m):
    return ((x + m - 1) // m) * m


# --------------------------------------------------------------------------------------
# Pallas kernel: one tile of TM flattened (batch*seq) rows per grid step.
#   ids_ref, pos_ref : (N_pad,) int32 scalar-prefetch arrays in SMEM
#   comb_hbm         : (V, D) combined token+geo table, resident in HBM (pl.ANY)
#   pos_hbm          : (P, D) position table, resident in HBM (pl.ANY)
#   gamma/beta       : (1, D) VMEM
#   out_ref          : (TM, D) VMEM output block
#   tok_buf/posb_buf : (TM, D) VMEM gather buffers (scratch)
#   sems             : (2,) DMA semaphores (shared across the TM row copies per table)
# --------------------------------------------------------------------------------------
def bert_embedding_kernel(ids_ref, pos_ref, comb_hbm, pos_hbm, gamma_ref, beta_ref,
                          out_ref, tok_buf, posb_buf, sems, *, eps):
    TM = tok_buf.shape[0]
    base = pl.program_id(0) * TM

    # ---- DMA row gather: start all TM token-row and position-row copies ------------
    @pl.loop(0, TM)
    def _start(r):
        tok_id = ids_ref[base + r]
        pos_id = pos_ref[base + r]
        pltpu.make_async_copy(comb_hbm.at[pl.ds(tok_id, 1), :],
                              tok_buf.at[pl.ds(r, 1), :], sems.at[0]).start()
        pltpu.make_async_copy(pos_hbm.at[pl.ds(pos_id, 1), :],
                              posb_buf.at[pl.ds(r, 1), :], sems.at[1]).start()

    # Wait for all gathers.  Every row copy has the same size, so per-row waits on the
    # shared per-table semaphores add up to exactly the signalled total.
    @pl.loop(0, TM)
    def _wait(r):
        pltpu.make_async_copy(comb_hbm.at[pl.ds(0, 1), :],
                              tok_buf.at[pl.ds(r, 1), :], sems.at[0]).wait()
        pltpu.make_async_copy(pos_hbm.at[pl.ds(0, 1), :],
                              posb_buf.at[pl.ds(r, 1), :], sems.at[1]).wait()

    # token + geo (pre-fused into comb_tab) + position.
    x = tok_buf[...] + posb_buf[...]                       # (TM, D) f32

    # LayerNorm (f32, biased variance — matches nn.LayerNorm).
    mu = jnp.mean(x, axis=-1, keepdims=True)
    var = jnp.mean(jnp.square(x - mu), axis=-1, keepdims=True)
    y = (x - mu) * jax.lax.rsqrt(var + eps)
    y = y * gamma_ref[...] + beta_ref[...]

    # Plain (TM, D) store — no reshape/relayout (lane-dense automatically once D % 128 == 0).
    out_ref[...] = y.astype(out_ref.dtype)


# --------------------------------------------------------------------------------------
# Plain-JAX glue: position ids (masked cumsum), matching the PyTorch code exactly.
# --------------------------------------------------------------------------------------
def create_position_ids_from_input_ids(input_ids, padding_idx, cls_idx, sep_idx,
                                       past_key_values_length=0):
    mask_pad = (input_ids != padding_idx).astype(jnp.int32)
    mask_cls = (input_ids != cls_idx).astype(jnp.int32)
    mask_sep = (input_ids != sep_idx).astype(jnp.int32)
    mask = mask_pad & mask_cls & mask_sep
    cls_indices = jnp.where(input_ids == cls_idx, 511, 0)
    sep_indices = jnp.where(input_ids == sep_idx, 512, 0)
    incremental = (jnp.cumsum(mask, axis=1) + past_key_values_length) * mask
    return incremental + cls_indices + sep_indices + padding_idx


def bert_embedding_forward(input_ids, params, config):
    B, S = input_ids.shape
    D = config['d_model']
    V = config['vocab_size']
    pad_idx = config['padding_idx']
    cls_idx = config['cls_idx']
    sep_idx = config['sep_idx']

    # NOTE: synthetic config -> pass the configured cls/sep ids (the original forward
    # relies on dataset-specific defaults 57255/57256 that equal self.cls_idx/self.sep_idx).
    pos_ids = create_position_ids_from_input_ids(input_ids, pad_idx, cls_idx, sep_idx)

    # ---- wrapper-time fusion of the geo path into the token table (one-time cost) ----
    # Zeroing the pad/cls/sep ROWS of geo_tab is equivalent to the per-token special mask,
    # because the row gather selects exactly one row per token.
    v_ids = jnp.arange(V)
    special_rows = (v_ids == pad_idx) | (v_ids == cls_idx) | (v_ids == sep_idx)
    geo_masked = jnp.where(special_rows[:, None], 0.0, params['geo_tab'])          # (V, 2)
    comb_tab = params['tok_tab'] + geo_masked @ params['w_geo'] + params['b_geo']  # (V, D)

    # ---- flatten (B, S) -> rows, pick a row tile TM (multiple of 8, >= 2 grid steps) ----
    N = B * S
    TM = 128
    while TM > 8 and pl.cdiv(N, TM) < 2:     # keep both v7x TensorCores busy when possible
        TM //= 2
    N_pad = _round_up(N, TM)

    ids_flat = input_ids.astype(jnp.int32).reshape(N)
    pos_flat = pos_ids.astype(jnp.int32).reshape(N)
    if N_pad > N:
        pad = jnp.full((N_pad - N,), pad_idx, jnp.int32)
        ids_flat = jnp.concatenate([ids_flat, pad])
        pos_flat = jnp.concatenate([pos_flat, pad])   # pad row of pos table is zeroed

    kernel = functools.partial(bert_embedding_kernel, eps=config['layer_norm_eps'])

    out = pl.pallas_call(
        kernel,
        out_shape=jax.ShapeDtypeStruct((N_pad, D), jnp.float32),
        grid_spec=pltpu.PrefetchScalarGridSpec(
            num_scalar_prefetch=2,                      # ids_flat, pos_flat -> SMEM
            grid=(N_pad // TM,),
            in_specs=[
                pl.BlockSpec(memory_space=pl.ANY),      # combined token+geo table (HBM)
                pl.BlockSpec(memory_space=pl.ANY),      # position table (HBM)
                pl.BlockSpec((1, D), lambda i, ids, pos: (0, 0)),   # LayerNorm gamma
                pl.BlockSpec((1, D), lambda i, ids, pos: (0, 0)),   # LayerNorm beta
            ],
            out_specs=pl.BlockSpec((TM, D), lambda i, ids, pos: (i, 0)),
            scratch_shapes=[
                pltpu.VMEM((TM, D), jnp.float32),       # gathered token+geo rows
                pltpu.VMEM((TM, D), jnp.float32),       # gathered position rows
                pltpu.SemaphoreType.DMA((2,)),          # one shared sem per table
            ]),
        compiler_params=pltpu.CompilerParams(
            dimension_semantics=("parallel",),
            vmem_limit_bytes=32 * 1024 * 1024),
    )(ids_flat, pos_flat, comb_tab, params['pos_tab'], params['gamma'], params['beta'])

    return out[:N].reshape(B, S, D)


# --------------------------------------------------------------------------------------
# Pure-JAX reference (mirrors the PyTorch forward: separate tok / pos / geo paths).
# --------------------------------------------------------------------------------------
def bert_embedding_reference(input_ids, params, config):
    pos_ids = create_position_ids_from_input_ids(
        input_ids, config['padding_idx'], config['cls_idx'], config['sep_idx'])
    tok_emb = params['tok_tab'][input_ids]
    pos_emb = params['pos_tab'][pos_ids]
    geo = params['geo_tab'][input_ids]
    special = (input_ids == config['padding_idx']) | (input_ids == config['cls_idx']) \
        | (input_ids == config['sep_idx'])
    geo = jnp.where(special[..., None], 0.0, geo)
    geo_emb = geo @ params['w_geo'] + params['b_geo'][0]
    x = tok_emb + pos_emb
    x = x + geo_emb
    mu = jnp.mean(x, axis=-1, keepdims=True)
    var = jnp.mean(jnp.square(x - mu), axis=-1, keepdims=True)
    y = (x - mu) * jax.lax.rsqrt(var + config['layer_norm_eps'])
    return y * params['gamma'][0] + params['beta'][0]


# --------------------------------------------------------------------------------------
# Deterministic parameter / input construction (synthetic; no checkpoint / file reads).
# --------------------------------------------------------------------------------------
def make_params(key, config):
    V, D, P = config['vocab_size'], config['d_model'], config['max_position_embedding']
    k = jax.random.split(key, 8)
    tok_tab = 0.02 * jax.random.normal(k[0], (V, D), jnp.float32)
    tok_tab = tok_tab.at[config['padding_index']].set(0.0)       # nn.Embedding padding_idx row
    pos_tab = 0.02 * jax.random.normal(k[1], (P, D), jnp.float32)
    pos_tab = pos_tab.at[config['padding_idx']].set(0.0)
    # Synthetic geo_dict (read_nodeOSM replaced): lat ~ [31, 32), lon ~ [121, 122).
    lat = 31.0 + jax.random.uniform(k[2], (V, 1), jnp.float32)
    lon = 121.0 + jax.random.uniform(k[3], (V, 1), jnp.float32)
    geo_tab = jnp.concatenate([lat, lon], axis=-1)               # (V, 2)
    w_geo = 0.1 * jax.random.normal(k[4], (2, D), jnp.float32)   # Linear(2, D) weight^T
    # Random (non-constant) bias: a constant bias makes the padding row a constant vector,
    # which is numerically degenerate under LayerNorm with eps=1e-12 (output is amplified
    # rounding noise and cannot be compared between implementations).
    b_geo = 0.02 * jax.random.normal(k[5], (1, D), jnp.float32)
    gamma = jnp.ones((1, D), jnp.float32) + 0.1 * jax.random.normal(k[6], (1, D), jnp.float32)
    beta = 0.05 * jax.random.normal(k[7], (1, D), jnp.float32)
    return dict(tok_tab=tok_tab, pos_tab=pos_tab, geo_tab=geo_tab,
                w_geo=w_geo, b_geo=b_geo, gamma=gamma, beta=beta)


if __name__ == "__main__":
    cfg = CONFIG
    B, S = 2, 8
    key = jax.random.PRNGKey(0)
    k_ids, k_par = jax.random.split(key)

    # Regular road-node tokens in [2, 61]; add cls / sep / padding special tokens.
    input_ids = jax.random.randint(k_ids, (B, S), 2, cfg['cls_idx'], dtype=jnp.int32)
    input_ids = input_ids.at[:, 0].set(cfg['cls_idx'])          # CLS at start
    input_ids = input_ids.at[:, S - 2].set(cfg['sep_idx'])      # SEP
    input_ids = input_ids.at[:, S - 1].set(cfg['padding_idx'])  # padding at the end

    params = make_params(k_par, cfg)

    out = jax.block_until_ready(bert_embedding_forward(input_ids, params, cfg))
    ref = jax.block_until_ready(bert_embedding_reference(input_ids, params, cfg))
    np.testing.assert_allclose(np.asarray(out), np.asarray(ref), rtol=1e-4, atol=1e-4)

    print("KERNEL_OK")
</pallas_src>

<mosaic_0001>
module attributes {stable_mosaic.version = 11 : i64} {
  func.func @bert_embedding_kernel(%arg0: i32, %arg1: memref<16xi32, #tpu.memory_space<smem>>, %arg2: memref<16xi32, #tpu.memory_space<smem>>, %arg3: memref<64x32xf32, #tpu.memory_space<any>>, %arg4: memref<520x32xf32, #tpu.memory_space<any>>, %arg5: memref<1x32xf32, #tpu.memory_space<vmem>>, %arg6: memref<1x32xf32, #tpu.memory_space<vmem>>, %arg7: memref<8x32xf32, #tpu.memory_space<vmem>>, %arg8: memref<8x32xf32, #tpu.memory_space<vmem>>, %arg9: memref<8x32xf32, #tpu.memory_space<vmem>>, %arg10: memref<2x!tpu.dma_semaphore, #tpu.memory_space<semaphore_mem>>) attributes {dimension_semantics = [#tpu.dimension_semantics<parallel>], iteration_bounds = array<i64: 2>, scalar_prefetch = 2 : i64, scratch_operands = 3 : i64, tpu.core_type = #tpu.core_type<tc>, window_params = [{}, {}, {pipeline_mode = #tpu.pipeline_mode<synchronous>, transform_indices = @transform_2, window_bounds = array<i64: 1, 32>}, {pipeline_mode = #tpu.pipeline_mode<synchronous>, transform_indices = @transform_3, window_bounds = array<i64: 1, 32>}, {transform_indices = @transform_4, window_bounds = array<i64: 8, 32>}]} {
    %c8_i32 = arith.constant 8 : i32
    %0 = arith.muli %arg0, %c8_i32 : i32
    %c0_i32 = arith.constant 0 : i32
    %c8_i32_0 = arith.constant 8 : i32
    %1 = arith.addi %c0_i32, %c8_i32_0 : i32
    %c1_i32 = arith.constant 1 : i32
    scf.for %arg11 = %c0_i32 to %1 step %c1_i32  : i32 {
      %c1_i32_19 = arith.constant 1 : i32
      %31 = arith.muli %arg11, %c1_i32_19 : i32
      %c0_i32_20 = arith.constant 0 : i32
      %32 = arith.addi %c0_i32_20, %31 : i32
      %33 = arith.addi %0, %32 : i32
      %34 = arith.index_cast %33 : i32 to index
      %35 = memref.load %arg1[%34] : memref<16xi32, #tpu.memory_space<smem>>
      %36 = arith.addi %0, %32 : i32
      %37 = arith.index_cast %36 : i32 to index
      %38 = memref.load %arg2[%37] : memref<16xi32, #tpu.memory_space<smem>>
      %c0_i32_21 = arith.constant 0 : i32
      %c0_i32_22 = arith.constant 0 : i32
      %39 = tpu.memref_slice %arg3[%35, %c0_i32_22] : memref<64x32xf32, #tpu.memory_space<any>> -> memref<1x32xf32, #tpu.memory_space<any>>
      %c0_i32_23 = arith.constant 0 : i32
      %40 = tpu.memref_slice %arg8[%32, %c0_i32_23] : memref<8x32xf32, #tpu.memory_space<vmem>> -> memref<1x32xf32, #tpu.memory_space<vmem>>
      %41 = tpu.memref_slice %arg10[%c0_i32_21] : memref<2x!tpu.dma_semaphore, #tpu.memory_space<semaphore_mem>> -> memref<1x!tpu.dma_semaphore, #tpu.memory_space<semaphore_mem>>
      %42 = tpu.memref_squeeze %41 : memref<1x!tpu.dma_semaphore, #tpu.memory_space<semaphore_mem>> -> memref<!tpu.dma_semaphore, #tpu.memory_space<semaphore_mem>>
      tpu.enqueue_dma source(%39 : memref<1x32xf32, #tpu.memory_space<any>>) target(%40 : memref<1x32xf32, #tpu.memory_space<vmem>>) target_semaphore(%42 : memref<!tpu.dma_semaphore, #tpu.memory_space<semaphore_mem>>)
      %c1_i32_24 = arith.constant 1 : i32
      %c0_i32_25 = arith.constant 0 : i32
      %43 = tpu.memref_slice %arg4[%38, %c0_i32_25] : memref<520x32xf32, #tpu.memory_space<any>> -> memref<1x32xf32, #tpu.memory_space<any>>
      %c0_i32_26 = arith.constant 0 : i32
      %44 = tpu.memref_slice %arg9[%32, %c0_i32_26] : memref<8x32xf32, #tpu.memory_space<vmem>> -> memref<1x32xf32, #tpu.memory_space<vmem>>
      %45 = tpu.memref_slice %arg10[%c1_i32_24] : memref<2x!tpu.dma_semaphore, #tpu.memory_space<semaphore_mem>> -> memref<1x!tpu.dma_semaphore, #tpu.memory_space<semaphore_mem>>
      %46 = tpu.memref_squeeze %45 : memref<1x!tpu.dma_semaphore, #tpu.memory_space<semaphore_mem>> -> memref<!tpu.dma_semaphore, #tpu.memory_space<semaphore_mem>>
      tpu.enqueue_dma source(%43 : memref<1x32xf32, #tpu.memory_space<any>>) target(%44 : memref<1x32xf32, #tpu.memory_space<vmem>>) target_semaphore(%46 : memref<!tpu.dma_semaphore, #tpu.memory_space<semaphore_mem>>)
    }
    %c8_i32_1 = arith.constant 8 : i32
    %c0_i32_2 = arith.constant 0 : i32
    %c8_i32_3 = arith.constant 8 : i32
    %2 = arith.addi %c0_i32_2, %c8_i32_3 : i32
    %c1_i32_4 = arith.constant 1 : i32
    scf.for %arg11 = %c0_i32_2 to %2 step %c1_i32_4  : i32 {
      %c1_i32_19 = arith.constant 1 : i32
      %31 = arith.muli %arg11, %c1_i32_19 : i32
      %c0_i32_20 = arith.constant 0 : i32
      %32 = arith.addi %c0_i32_20, %31 : i32
      %c0_i32_21 = arith.constant 0 : i32
      %c0_i32_22 = arith.constant 0 : i32
      %c0_i32_23 = arith.constant 0 : i32
      %33 = tpu.memref_slice %arg3[%c0_i32_22, %c0_i32_23] : memref<64x32xf32, #tpu.memory_space<any>> -> memref<1x32xf32, #tpu.memory_space<any>>
      %c0_i32_24 = arith.constant 0 : i32
      %34 = tpu.memref_slice %arg8[%32, %c0_i32_24] : memref<8x32xf32, #tpu.memory_space<vmem>> -> memref<1x32xf32, #tpu.memory_space<vmem>>
      %35 = tpu.memref_slice %arg10[%c0_i32_21] : memref<2x!tpu.dma_semaphore, #tpu.memory_space<semaphore_mem>> -> memref<1x!tpu.dma_semaphore, #tpu.memory_space<semaphore_mem>>
      %36 = tpu.memref_squeeze %35 : memref<1x!tpu.dma_semaphore, #tpu.memory_space<semaphore_mem>> -> memref<!tpu.dma_semaphore, #tpu.memory_space<semaphore_mem>>
      tpu.wait_dma2 semaphore(%36 : memref<!tpu.dma_semaphore, #tpu.memory_space<semaphore_mem>>) src(%33 : memref<1x32xf32, #tpu.memory_space<any>>) dst(%34 : memref<1x32xf32, #tpu.memory_space<vmem>>)
      %c1_i32_25 = arith.constant 1 : i32
      %c0_i32_26 = arith.constant 0 : i32
      %c0_i32_27 = arith.constant 0 : i32
      %37 = tpu.memref_slice %arg4[%c0_i32_26, %c0_i32_27] : memref<520x32xf32, #tpu.memory_space<any>> -> memref<1x32xf32, #tpu.memory_space<any>>
      %c0_i32_28 = arith.constant 0 : i32
      %38 = tpu.memref_slice %arg9[%32, %c0_i32_28] : memref<8x32xf32, #tpu.memory_space<vmem>> -> memref<1x32xf32, #tpu.memory_space<vmem>>
      %39 = tpu.memref_slice %arg10[%c1_i32_25] : memref<2x!tpu.dma_semaphore, #tpu.memory_space<semaphore_mem>> -> memref<1x!tpu.dma_semaphore, #tpu.memory_space<semaphore_mem>>
      %40 = tpu.memref_squeeze %39 : memref<1x!tpu.dma_semaphore, #tpu.memory_space<semaphore_mem>> -> memref<!tpu.dma_semaphore, #tpu.memory_space<semaphore_mem>>
      tpu.wait_dma2 semaphore(%40 : memref<!tpu.dma_semaphore, #tpu.memory_space<semaphore_mem>>) src(%37 : memref<1x32xf32, #tpu.memory_space<any>>) dst(%38 : memref<1x32xf32, #tpu.memory_space<vmem>>)
    }
    %c8_i32_5 = arith.constant 8 : i32
    %c0 = arith.constant 0 : index
    %c0_6 = arith.constant 0 : index
    %3 = vector.load %arg8[%c0, %c0_6] : memref<8x32xf32, #tpu.memory_space<vmem>>, vector<8x32xf32>
    %c0_7 = arith.constant 0 : index
    %c0_8 = arith.constant 0 : index
    %4 = vector.load %arg9[%c0_7, %c0_8] : memref<8x32xf32, #tpu.memory_space<vmem>>, vector<8x32xf32>
    %5 = arith.addf %3, %4 : vector<8x32xf32>
    %cst = arith.constant dense<0.000000e+00> : vector<8xf32>
    %6 = vector.multi_reduction <add>, %5, %cst [1] : vector<8x32xf32> to vector<8xf32>
    %7 = vector.shape_cast %6 : vector<8xf32> to vector<8x1xf32>
    %cst_9 = arith.constant 3.200000e+01 : f32
    %8 = vector.broadcast %cst_9 : f32 to vector<8x1xf32>
    %9 = arith.divf %7, %8 : vector<8x1xf32>
    %10 = vector.broadcast %9 : vector<8x1xf32> to vector<8x32xf32>
    %11 = arith.subf %5, %10 : vector<8x32xf32>
    %12 = arith.mulf %11, %11 : vector<8x32xf32>
    %cst_10 = arith.constant dense<0.000000e+00> : vector<8xf32>
    %13 = vector.multi_reduction <add>, %12, %cst_10 [1] : vector<8x32xf32> to vector<8xf32>
    %14 = vector.shape_cast %13 : vector<8xf32> to vector<8x1xf32>
    %cst_11 = arith.constant 3.200000e+01 : f32
    %15 = vector.broadcast %cst_11 : f32 to vector<8x1xf32>
    %16 = arith.divf %14, %15 : vector<8x1xf32>
    %17 = vector.broadcast %9 : vector<8x1xf32> to vector<8x32xf32>
    %18 = arith.subf %5, %17 : vector<8x32xf32>
    %cst_12 = arith.constant 9.99999996E-13 : f32
    %19 = vector.broadcast %cst_12 : f32 to vector<8x1xf32>
    %20 = arith.addf %16, %19 : vector<8x1xf32>
    %21 = math.rsqrt %20 : vector<8x1xf32>
    %22 = vector.broadcast %21 : vector<8x1xf32> to vector<8x32xf32>
    %23 = arith.mulf %18, %22 : vector<8x32xf32>
    %c0_13 = arith.constant 0 : index
    %c0_14 = arith.constant 0 : index
    %24 = vector.load %arg5[%c0_13, %c0_14] : memref<1x32xf32, #tpu.memory_space<vmem>>, vector<1x32xf32>
    %25 = vector.broadcast %24 : vector<1x32xf32> to vector<8x32xf32>
    %26 = arith.mulf %23, %25 : vector<8x32xf32>
    %c0_15 = arith.constant 0 : index
    %c0_16 = arith.constant 0 : index
    %27 = vector.load %arg6[%c0_15, %c0_16] : memref<1x32xf32, #tpu.memory_space<vmem>>, vector<1x32xf32>
    %28 = vector.broadcast %27 : vector<1x32xf32> to vector<8x32xf32>
    %29 = arith.addf %26, %28 : vector<8x32xf32>
    %c0_17 = arith.constant 0 : index
    %c0_18 = arith.constant 0 : index
    %30 = vector.load %arg7[%c0_17, %c0_18] : memref<8x32xf32, #tpu.memory_space<vmem>>, vector<8x32xf32>
    tpu.vector_store %arg7[%c0_17, %c0_18], %29 {strides = array<i32>} : memref<8x32xf32, #tpu.memory_space<vmem>>, vector<8x32xf32>,
    return
  }
  func.func @transform_2(%arg0: i32, %arg1: memref<16xi32, #tpu.memory_space<smem>>, %arg2: memref<16xi32, #tpu.memory_space<smem>>) -> (i32, i32) {
    %c0_i32 = arith.constant 0 : i32
    %c0_i32_0 = arith.constant 0 : i32
    %c0_i32_1 = arith.constant 0 : i32
    return %c0_i32, %c0_i32_0 : i32, i32
  }
  func.func @transform_3(%arg0: i32, %arg1: memref<16xi32, #tpu.memory_space<smem>>, %arg2: memref<16xi32, #tpu.memory_space<smem>>) -> (i32, i32) {
    %c0_i32 = arith.constant 0 : i32
    %c0_i32_0 = arith.constant 0 : i32
    %c0_i32_1 = arith.constant 0 : i32
    return %c0_i32, %c0_i32_0 : i32, i32
  }
  func.func @transform_4(%arg0: i32, %arg1: memref<16xi32, #tpu.memory_space<smem>>, %arg2: memref<16xi32, #tpu.memory_space<smem>>) -> (i32, i32) {
    %c0_i32 = arith.constant 0 : i32
    %c0_i32_0 = arith.constant 0 : i32
    return %arg0, %c0_i32 : i32, i32
  }
}

</mosaic_0001>

<bundles_post_ra>
// kernel: tpu_custom_call.1
= control target key start
LH: loop header
LB: loop body
LE: loop exit
PB: predicated region body
PF: predicated region fallthrough
CT: control target
= control target key end

     0   :  { %s742_s0 = inlined_call_operand.vmem [shape: s32[16], index: 0, kind: input, shape index: {}]   ;;  %s743_s2 = inlined_call_operand.vmem [shape: f32[64,32], index: 2, kind: input, shape index: {}]   ;;  %s744_s3 = inlined_call_operand.vmem [shape: f32[520,32], index: 3, kind: input, shape index: {}]   ;;  %s745_s4 = inlined_call_operand.vmem [shape: f32[1,32], index: 4, kind: input, shape index: {}]   ;;  %s746_s5 = inlined_call_operand.vmem [shape: f32[1,32], index: 5, kind: input, shape index: {}]   ;;  %s747_s6 = inlined_call_operand.hbm [shape: f32[16,32], index: 6, kind: output, shape index: {}]   ;;  %s748_s1 = inlined_call_operand.vmem [shape: s32[16], index: 1, kind: input, shape index: {}]  }
   0x1   :  { %s11_s23 = sshll.u32 %s742_s0, 4  ;;  %s15_s26 = sshll.u32 %s748_s1, 4  ;;  %s12_s23 = int_to_ptr.vmem [resolvable:$true] %s11_s23  ;;  %s16_s26 = int_to_ptr.vmem [resolvable:$true] %s15_s26 }
   0x2   :  { %s466_s27 = scalar_lea.vmem %s12_s23, 16  ;;  %p471_p1 = scmp.lt.s32.totalorder %s12_s23, %s12_s23 }
   0x3   :  { %p467_p0 = scmp.ne.s32.totalorder %s12_s23, %s466_s27  ;;  %p472_p2 = scmp.lt.s32.totalorder %s466_s27, %s466_s27 }
   0x5   :  { %p473_p3 = por %p472_p2, %p471_p1 }
   0x7   :  { %p474_p4 = pnand %p473_p3, %p467_p0 }
   0x9   :  { %477 = shalt.err (!%p474_p4)  }
   0xa   :  { %s576_s28 = smov [#allocation6]   ;;  %s478_s29 = scalar_lea.vmem %s16_s26, 16 }
   0xb   :  { %14 = dma.vmem_to_smem %s12_s23, 16, %s576_s28, [#allocation5] }
   0xc   :  { %p479_p5 = scmp.ne.s32.totalorder %s16_s26, %s478_s29  ;;  %p483_p6 = scmp.lt.s32.totalorder %s16_s26, %s16_s26 }
   0xd   :  { %p484_p7 = scmp.lt.s32.totalorder %s478_s29, %s478_s29 }
   0xf   :  { %p485_p8 = por %p484_p7, %p483_p6 }
  0x11   :  { %p486_p9 = pnand %p485_p8, %p479_p5 }
  0x13   :  { %489 = shalt.err (!%p486_p9)  }
  0x14   :  { %s577_s0 = smov [#allocation7]  }
  0x15   :  { %18 = dma.vmem_to_smem %s16_s26, 16, %s577_s0, [#allocation5] }
  0x16   :  { %542 = dma.done.wait [#allocation5], 32 }
  0x17   :  { %543 = vsyncadd [#allocation5], 4294967264 }
  0x18   :  { %20 = sfence }
  0x19   :  { %21 = vsyncpa [#allocation9], 0 }
  0x1a   :  { %23 = vsyncpa [#allocation9 + $0x1], 0  ;;  %s620_s1 = smov 0   ;;  %s622_s30 = smov 0  }
  0x1b   :  { %s624_s7 = smov 0   ;;  %s626_s8 = smov 0  }
  0x1c LB: > { %s641_s9 = sadd.s32 4294967295, %s566_s8   ;;  %s394_s10 = sadd.s32 4294967294, %s566_s8   ;;  %s566_s8 = sphi %s626_s8, %s754_s8   ;;  %s562_s7 = sphi %s624_s7, %s753_s7   ;;  %s558_s30 = sphi %s622_s30, %s752_s30   ;;  %s554_s1 = sphi %s620_s1, %s751_s1  }
  0x1d   : > { %s645_s11 = sadd.s32 1, %s566_s8   ;;  %s78_s12 = sadd.s32 1, %s562_s7 }
  0x1e   : > { %s75_s13 = ssub.s32 %s566_s8, %s645_s11  ;;  %p88_p10 = scmp.ne.s32.totalorder %s562_s7, %s558_s30 }
  0x1f   : > { %p76_p11 = scmp.eq.s32.totalorder %s75_s13, 0  ;;  %p89_p12 = scmp.eq.s32.totalorder %s641_s9, 1 }
  0x20   : > { %p94_p13 = scmp.ne.s32.totalorder %s558_s30, %s554_s1  ;;  %p95_p0 = scmp.eq.s32.totalorder %s394_s10, 1 }
  0x21   : > { %s656_s14 = scalar_select %p76_p11, %s562_s7, %s78_s12  }
  0x22   : > { %p658_p1 = por %p89_p12, %p88_p10  ;;  %p662_p2 = por %p95_p0, %p94_p13 }
  0x23   : > { %p396_p3 = scmp.ge.s32.totalorder %s566_s8, 1  ;;  %p119_p4 = scmp.lt.s32.totalorder %s566_s8, 3 }
  0x25   : > { %p120_p5 = pnand %p396_p3, %p119_p4 }
  0x26   : > { %s133_s17 = sand.u32 (!%p120_p5), 1, %s558_s30   ;;  %s398_s18 = sshll.u32 (!%p120_p5), %s641_s9, 3 }
  0x27   : > { %123 = sbr.rel (%p120_p5) target bundleno = 404 (0x194), region = 28  ;;  %s672_s19 = sshll.u32 (!%p120_p5), %s133_s17, 3 }
  0x28   : > { %s135_s20 = scalar_lea.vmem (!%p120_p5), [#allocation8], %s672_s19  ;;  %s568_s21 = smov (!%p120_p5), 0  }
  0x2e LB: >> { %s143_s22 = sadd.s32 %s570_s21, %s398_s18  ;;  %s147_s28 = scalar_lea.vmem [#allocation2], %s570_s21  ;;  %s570_s21 = sphi %s568_s21, %s142_s21  }
  0x2f   : >> { %s144_s23 = sld [smem:[#allocation6 + %s143_s22]] }
  0x30   : >> { %s145_s24 = sld [smem:[#allocation7 + %s143_s22]] }
  0x35   : >> { %s146_s27 = scalar_lea.vmem %s743_s2, %s144_s23 }
  0x36   : >> { %v165_v0 = vld [vmem:[%s146_s27] sm:$0x1] }
  0x37   : >> { %166 = vst [vmem:[%s147_s28] sm:$0x1] %v165_v0 }
  0x38   : >> { %191 = vsyncadd [#allocation4], 16  ;;  %s192_s10 = scalar_lea.vmem %s744_s3, %s145_s24  ;;  %s193_s12 = scalar_lea.vmem [#allocation3], %s570_s21 }
  0x39   : >> { %v212_v1 = vld [vmem:[%s192_s10] sm:$0x1] }
  0x3a   : >> { %213 = vst [vmem:[%s193_s12] sm:$0x1] %v212_v1 }
  0x3b   : >> { %238 = vsyncadd [#allocation4 + $0x1], 16  ;;  %s142_s21 = sadd.s32 1, %s570_s21  }
  0x3c   : >> { %p139_p6 = scmp.ge.s32.totalorder %s142_s21, 8  }
  0x3d   : > { %s572_s13 = smov (%p139_p6), 0  }
  0x3e   : > { %141 = sbr.rel (!%p139_p6) target bundleno = 46 (0x2e), region = 161 }
  0x45 LB: >> { %544 = dma.done.wait [#allocation4], 16  ;;  %s574_s13 = sphi %s572_s13, %s244_s13  }
  0x46   : >> { %545 = vsyncadd [#allocation4], 4294967280 }
  0x47   : >> { %546 = dma.done.wait [#allocation4 + $0x1], 16 }
  0x48   : >> { %547 = vsyncadd [#allocation4 + $0x1], 4294967280  ;;  %s244_s13 = sadd.s32 1, %s574_s13  }
  0x49   : >> { %p241_p7 = scmp.ge.s32.totalorder %s244_s13, 8  }
  0x4a   : > { %v251_v2 = vld [vmem:[#allocation2] sm:$0xff] (%p241_p7)  ;;  %v252_v3 = vld [vmem:[#allocation3] sm:$0xff] (%p241_p7)  ;;  %vm254_vm0 = vcmask (%p241_p7), 261120   ;;  %s402_s24 = sshll.u32 (%p241_p7), %s641_s9, 7  ;;  %s300_s25 = sshll.u32 (%p241_p7), %s135_s20, 4  ;;  %s697_s25 = int_to_ptr.vmem [resolvable:$true] %s300_s25 }
  0x4b   : > { %243 = sbr.rel (!%p241_p7) target bundleno = 69 (0x45), region = 172  ;;  %v253_v4 = vadd.f32 (%p241_p7), %v252_v3, %v251_v2  ;;  %v399_v15 = vld [vmem:[%s745_s4] ss:$0 sm:$0xff] (%p241_p7)  ;;  %s695_s28 = scalar_lea.hbm (%p241_p7), %s747_s6, %s402_s24 }
  0x4c   : > { %v400_v17 = vld [vmem:[%s746_s5] ss:$0 sm:$0xff] (%p241_p7)  ;;  %s287_s29 = scalar_lea.sflag (%p241_p7), [#allocation9], %s133_s17  ;;  %s490_s9 = scalar_lea.vmem (%p241_p7), %s697_s25, 128 }
  0x4d   : > { %v255_v5 = vsel (%p241_p7), %vm254_vm0, %v253_v4, 0.0  ;;  %p491_p8 = scmp.ne.s32.totalorder (%p241_p7), %s697_s25, %s490_s9  ;;  %s578_s0 = smov (%p241_p7), [#allocation8]  }
  0x4e   : > { %256 = vadd.xlane.f32.xlu0 (%p241_p7), %v255_v5  ;;  %s494_s10 = sshll.u32 (%p241_p7), %s578_s0, 4  ;;  %s495_s10 = int_to_ptr.vmem [resolvable:$false] %s494_s10 }
  0x4f   : > { %p492_p9 = pnand (%p241_p7), %p491_p8, %p658_p1  ;;  %s496_s12 = scalar_lea.vmem (%p241_p7), %s495_s10, 256 }
  0x50   : > { %p497_p11 = scmp.lt.s32.totalorder (%p241_p7), %s697_s25, %s495_s10  ;;  %p498_p12 = scmp.lt.s32.totalorder (%p241_p7), %s496_s12, %s490_s9 }
  0x51   : > { %p493_p10 = pneg (%p241_p7), %p492_p9 }
  0x52   : > { %p499_p13 = por %p498_p12, %p497_p11 }
  0x54   : > { %p500_p0 = pnand %p499_p13, %p493_p10 }
  0xdb   : > { %v257_v6 = vpop.xlane.xlu0 %256 }
  0xdc   : > { %v259_v7 = vmul.f32 0.03125, %v257_v6 }
  0xde   : > { %v260_v8 = vsub.f32 %v253_v4, %v259_v7 }
  0xe0   : > { %v261_v9 = vmul.f32 %v260_v8, %v260_v8 }
  0xe2   : > { %v262_v10 = vsel %vm254_vm0, %v261_v9, 0.0 }
  0xe3   : > { %263 = vadd.xlane.f32.xlu0 %v262_v10 }
 0x170   : > { %v264_v11 = vpop.xlane.xlu0 %263 }
 0x171   : > { %v265_v12 = vmul.f32 0.03125, %v264_v11 }
 0x173   : > { %v266_v13 = vadd.f32 1e-12, %v265_v12 }
 0x175   : > { %464 = vrsqrt.f32 %v266_v13 }
 0x17f   : > { %v465_v14 = vpop.eup %464 }
 0x180   : > { %v268_v16 = vmul.f32 %v465_v14, %v260_v8 }
 0x182   : > { %v276_v18 = vmul.f32 %v399_v15, %v268_v16 }
 0x184   : > { %v284_v19 = vadd.f32 %v400_v17, %v276_v18 }
 0x186   : > { %285 = vst.msk [vmem:[%s135_s20] sm:$0xff] %vm254_vm0, %v284_v19 }
 0x187   : > { %503 = shalt.err (!%p500_p0)
}
 0x188   : > { %s504_s17 = scalar_lea.hbm %s695_s28, 128  ;;  %s508_s13 = scalar_lea.hbm %s747_s6, 256 }
 0x189   : > { %p505_p3 = scmp.ne.s32.totalorder %s695_s28, %s504_s17  ;;  %p509_p6 = scmp.lt.u32.totalorder %s695_s28, %s747_s6 }
 0x18a   : > { %p510_p7 = scmp.lt.u32.totalorder %s508_s13, %s504_s17  ;;  %p512_p9 = scmp.lt.u32.totalorder %s504_s17, %s695_s28 }
 0x18b   : > { %p506_p4 = pnand %p505_p3, %p658_p1 }
 0x18c   : > { %p511_p8 = por %p510_p7, %p509_p6 }
 0x18d   : > { %p507_p5 = pneg %p506_p4 }
 0x18e   : > { %p513_p10 = por %p512_p9, %p511_p8 }
 0x190   : > { %p514_p11 = pnand %p513_p10, %p507_p5 }
 0x192   : > { %517 = shalt.err (!%p514_p11)
}
 0x193   : > { %407 = dma.vmem_to_hbm [thread:$0]  (%p658_p1), %s697_s25, 128, %s695_s28, %s287_s29  }
 0x194 PF: > { %p413_p12 = scmp.ge.s32.totalorder %s566_s8, 2  ;;  %s312_s22 = sand.u32 1, %s554_s1  }
 0x195   : > { %s313_s23 = scalar_lea.sflag [#allocation9], %s312_s22 }
 0x196   : > { %p410_p13 = pnand %p413_p12, %p662_p2 }
 0x198   : > { %549 = dma.done.wait (!%p410_p13), %s313_s23, 128  }
 0x199   : > { %551 = vsyncadd (!%p410_p13), %s313_s23, 4294967168  ;;  %p26_p0 = scmp.ge.s32.totalorder %s645_s11, 4   ;;  %s751_s1 = smov %s558_s30 }
 0x19a   : > { %s752_s30 = smov %s562_s7  ;;  %s753_s7 = smov %s656_s14 }
 0x19b   : > { %s754_s8 = smov %s645_s11  ;;  %28 = sbr.rel (!%p26_p0) target bundleno = 28 (0x1c), region = 183 }
 0x1a2   :  { %318 = vsyncpa [#allocation9], 1 }
 0x1a3   :  { %320 = vsyncpa [#allocation9 + $0x1], 1 }
 0x1a4   :  { %321 = vsyncmov [#allocation4] }
 0x1a7   :  { %s322_s8 = vpop.sfrf %321 }
 0x1a8   :  { %p405_p1 = scmp.ne.s32.totalorder %s322_s8, 0 }
 0x1aa   :  { %326 = shalt.err (%p405_p1)  }
 0x1ab   :  { %328 = vsyncmov [#allocation4 + $0x1] }
 0x1ae   :  { %s329_s15 = vpop.sfrf %328 }
 0x1af   :  { %p406_p2 = scmp.ne.s32.totalorder %s329_s15, 0 }
 0x1b1   :  { %333 = shalt.err (%p406_p2)  }

</bundles_post_ra>
